<compile_context>
chip_gen: v5e
topology: v5e:2x2
jax: 0.10.0
libtpu: 0.0.40
codegen_flags: <defaults>
</compile_context>

<pallas_src>
import functools
import numpy as np

import jax
import jax.numpy as jnp
from jax.experimental import pallas as pl
from jax.experimental.pallas import tpu as pltpu


def make_positional_encoding_table(embed: int, pad_size: int,
                                   dtype=jnp.float32) -> jnp.ndarray:
    """Deterministic sin/cos table identical to the PyTorch __init__."""
    pos = np.arange(pad_size, dtype=np.float64)[:, None]            # (S, 1)
    i = np.arange(embed, dtype=np.float64)[None, :]                  # (1, E)
    angle = pos / np.power(10000.0, ((i // 2) * 2.0) / embed)
    pe = np.array(angle, dtype=np.float64)
    pe[:, 0::2] = np.sin(pe[:, 0::2])
    pe[:, 1::2] = np.cos(pe[:, 1::2])
    return jnp.asarray(pe, dtype=dtype)


# ----------------------------------------------------------------------------
# Kernels (operate on flattened (rows, lanes) tiles)
# ----------------------------------------------------------------------------
def _pe_add_kernel(x_ref, pe_ref, o_ref):
    # x_ref: (tB, tL), pe_ref: (1, tL) -> broadcast over the sublane (row) axis.
    o_ref[...] = x_ref[...] + pe_ref[...]


def _pe_add_dropout_kernel(x_ref, pe_ref, bits_ref, o_ref, *, threshold, scale):
    out = x_ref[...] + pe_ref[...]
    # Integer threshold compare: keep with prob (2^32 - threshold) / 2^32 = 1 - p.
    keep = bits_ref[...] >= jnp.uint32(threshold)
    o_ref[...] = jnp.where(keep, out * scale, jnp.zeros_like(out))


# ----------------------------------------------------------------------------
# Tile-size selection (divisor-aligned so BlockSpec constraints always hold)
# ----------------------------------------------------------------------------
def _pick_lane_tile(L: int, itemsize: int, budget_bytes: int) -> int:
    """Largest lane tile <= budget that is a multiple of 128 and divides L
    (or L itself when L fits the budget / has no aligned divisor)."""
    max_elems = max(128, budget_bytes // itemsize)
    if L <= max_elems:
        return L
    t = (max_elems // 128) * 128
    while t >= 128:
        if L % t == 0:
            return t
        t -= 128
    return L  # fallback: full dim (rare; rely on VMEM limit)


def _pick_row_tile(B: int, tL: int, itemsize: int, budget_bytes: int) -> int:
    """Largest row tile keeping the block <= budget, multiple of 8 dividing B
    (or B itself when it fits / has no aligned divisor)."""
    max_rows = max(1, budget_bytes // max(1, tL * itemsize))
    if B <= max_rows:
        return B
    t = (max_rows // 8) * 8
    while t >= 8:
        if B % t == 0:
            return t
        t -= 8
    return B  # fallback: full dim


# ----------------------------------------------------------------------------
# Wrapper
# ----------------------------------------------------------------------------
def positional_encoding_forward(x: jnp.ndarray,
                                pe: jnp.ndarray,
                                *,
                                dropout_p: float = 0.0,
                                training: bool = False,
                                rng_key=None,
                                block_bytes: int = 1 << 20) -> jnp.ndarray:
    """out = dropout(x + pe). x: (B, S, E), pe: (S, E)."""
    B, S, E = x.shape
    assert pe.shape == (S, E)
    p = float(dropout_p) if training else 0.0
    assert 0.0 <= p < 1.0, "dropout probability must be in [0, 1)"

    L = S * E
    itemsize = x.dtype.itemsize
    xf = x.reshape(B, L)                              # lane-dense layout
    pef = pe.astype(x.dtype).reshape(1, L)            # pre-cast: fewer DMA bytes

    tL = _pick_lane_tile(L, itemsize, block_bytes)
    tB = _pick_row_tile(B, tL, itemsize, block_bytes)
    grid = (B // tB, L // tL)

    x_spec = pl.BlockSpec((tB, tL), lambda i, j: (i, j))
    pe_spec = pl.BlockSpec((1, tL), lambda i, j: (0, j))   # re-used across rows
    out_spec = pl.BlockSpec((tB, tL), lambda i, j: (i, j))

    x_bytes = B * L * itemsize
    pe_bytes = L * itemsize

    if p > 0.0:
        if rng_key is None:
            rng_key = jax.random.PRNGKey(0)
        # TODO(synk): mask stream comes from jax.random (counter-based), not
        # torch's RNG, so it is distributionally equivalent but not bit-identical.
        bits = jax.random.bits(rng_key, (B, L), dtype=jnp.uint32)
        threshold = min(int(round(p * (1 << 32))), (1 << 32) - 1)
        kernel = functools.partial(_pe_add_dropout_kernel,
                                   threshold=threshold,
                                   scale=1.0 / (1.0 - p))
        in_specs = [x_spec, pe_spec, pl.BlockSpec((tB, tL), lambda i, j: (i, j))]
        operands = (xf, pef, bits)
        cost = pl.CostEstimate(flops=3 * B * L, transcendentals=0,
                               bytes_accessed=2 * x_bytes + pe_bytes + B * L * 4)
    else:
        kernel = _pe_add_kernel
        in_specs = [x_spec, pe_spec]
        operands = (xf, pef)
        cost = pl.CostEstimate(flops=B * L, transcendentals=0,
                               bytes_accessed=2 * x_bytes + pe_bytes)

    out = pl.pallas_call(
        kernel,
        out_shape=jax.ShapeDtypeStruct((B, L), x.dtype),
        grid=grid,
        in_specs=in_specs,
        out_specs=out_spec,
        compiler_params=pltpu.CompilerParams(
            dimension_semantics=("parallel", "parallel")),
        cost_estimate=cost,
    )(*operands)

    return out.reshape(B, S, E)


if __name__ == "__main__":
    # Small shapes implied by the module: batch=2, pad_size=8, embed=32.
    B, S, E = 2, 8, 32
    dropout_p = 0.1

    key = jax.random.PRNGKey(0)
    kx, kd = jax.random.split(key)
    x = jax.random.normal(kx, (B, S, E), dtype=jnp.float32)
    pe = make_positional_encoding_table(E, S)

    # Eval-mode forward (dropout is identity) -- matches PyTorch .eval() exactly.
    out = positional_encoding_forward(x, pe, dropout_p=dropout_p, training=False)
    out = jax.block_until_ready(out)
    ref = x + pe[None, :, :]
    np.testing.assert_allclose(np.asarray(out), np.asarray(ref),
                               rtol=1e-6, atol=1e-6)

    # Training-mode forward (inverted dropout driven by external uint32 bits).
    out_train = positional_encoding_forward(x, pe, dropout_p=dropout_p,
                                            training=True, rng_key=kd)
    out_train = jax.block_until_ready(out_train)
    ot = np.asarray(out_train)
    rf = np.asarray(ref)
    kept = ot != 0.0
    np.testing.assert_allclose(ot[kept],
                               (rf / (1.0 - dropout_p))[kept],
                               rtol=1e-5, atol=1e-5)

    print("KERNEL_OK")
</pallas_src>

<mosaic_0001>
module attributes {stable_mosaic.version = 11 : i64} {
  func.func @_pe_add_kernel(%arg0: i32, %arg1: i32, %arg2: memref<2x256xf32, #tpu.memory_space<vmem>>, %arg3: memref<1x256xf32, #tpu.memory_space<vmem>>, %arg4: memref<2x256xf32, #tpu.memory_space<vmem>>) attributes {dimension_semantics = [#tpu.dimension_semantics<parallel>, #tpu.dimension_semantics<parallel>], iteration_bounds = array<i64: 1, 1>, scalar_prefetch = 0 : i64, scratch_operands = 0 : i64, tpu.core_type = #tpu.core_type<tc>, window_params = [{transform_indices = @transform_0, window_bounds = array<i64: 2, 256>}, {transform_indices = @transform_1, window_bounds = array<i64: 1, 256>}, {transform_indices = @transform_2, window_bounds = array<i64: 2, 256>}]} {
    %c0 = arith.constant 0 : index
    %c0_0 = arith.constant 0 : index
    %0 = vector.load %arg2[%c0, %c0_0] : memref<2x256xf32, #tpu.memory_space<vmem>>, vector<2x256xf32>
    %c0_1 = arith.constant 0 : index
    %c0_2 = arith.constant 0 : index
    %1 = vector.load %arg3[%c0_1, %c0_2] : memref<1x256xf32, #tpu.memory_space<vmem>>, vector<1x256xf32>
    %2 = vector.broadcast %1 : vector<1x256xf32> to vector<2x256xf32>
    %3 = arith.addf %0, %2 : vector<2x256xf32>
    %c0_3 = arith.constant 0 : index
    %c0_4 = arith.constant 0 : index
    %4 = vector.load %arg4[%c0_3, %c0_4] : memref<2x256xf32, #tpu.memory_space<vmem>>, vector<2x256xf32>
    tpu.vector_store %arg4[%c0_3, %c0_4], %3 {strides = array<i32>} : memref<2x256xf32, #tpu.memory_space<vmem>>, vector<2x256xf32>,
    return
  }
  func.func @transform_0(%arg0: i32, %arg1: i32) -> (i32, i32) {
    %c0_i32 = arith.constant 0 : i32
    return %arg0, %arg1 : i32, i32
  }
  func.func @transform_1(%arg0: i32, %arg1: i32) -> (i32, i32) {
    %c0_i32 = arith.constant 0 : i32
    %c0_i32_0 = arith.constant 0 : i32
    return %c0_i32, %arg1 : i32, i32
  }
  func.func @transform_2(%arg0: i32, %arg1: i32) -> (i32, i32) {
    %c0_i32 = arith.constant 0 : i32
    return %arg0, %arg1 : i32, i32
  }
}

</mosaic_0001>

<bundles_post_ra>
// kernel: tpu_custom_call.1
= control target key start
LH: loop header
LB: loop body
LE: loop exit
PB: predicated region body
PF: predicated region fallthrough
CT: control target
= control target key end

     0   :  { %7 = vsyncpa [#allocation3], 0  ;;  %s177_s0 = inlined_call_operand.hbm [shape: f32[2,256], index: 0, kind: input, shape index: {}]   ;;  %s178_s1 = inlined_call_operand.hbm [shape: f32[1,256], index: 1, kind: input, shape index: {}]   ;;  %s179_s2 = inlined_call_operand.hbm [shape: f32[2,256], index: 2, kind: output, shape index: {}]  }
   0x1   :  { %8 = vsyncpa [#allocation6], 0 }
   0x2   :  { %9 = vsyncpa [#allocation4], 0  ;;  %s15_s11 = sshll.u32 %s177_s0, 4  ;;  %s150_s12 = smov [#allocation2]   ;;  %s16_s11 = int_to_ptr.hbm [resolvable:$true] %s15_s11 }
   0x3   :  { %s17_s13 = sshll.u32 %s150_s12, 4  ;;  %s26_s16 = sshll.u32 %s178_s1, 4  ;;  %s18_s13 = int_to_ptr.vmem [resolvable:$true] %s17_s13  ;;  %s27_s16 = int_to_ptr.hbm [resolvable:$true] %s26_s16 }
   0x4   :  { %20 = dma.hbm_to_vmem [thread:$0]  %s16_s11, 64, %s18_s13, [#allocation3]  }
   0x5   :  { %s151_s17 = smov [#allocation5]  }
   0x6   :  { %s28_s18 = sshll.u32 %s151_s17, 4  ;;  %s29_s18 = int_to_ptr.vmem [resolvable:$true] %s28_s18 }
   0x7   :  { %31 = dma.hbm_to_vmem [thread:$0]  %s27_s16, 32, %s29_s18, [#allocation6]  }
   0x8   :  { %144 = dma.done.wait [#allocation3], 64  }
   0x9   :  { %145 = vsyncadd [#allocation3], 4294967232 }
   0xa   :  { %146 = dma.done.wait [#allocation6], 32  }
   0xb   :  { %147 = vsyncadd [#allocation6], 4294967264  ;;  %v41_v0 = vld [vmem:[#allocation5] sm:$0x3]  ;;  %vm46_vm0 = vcmask 1041408   ;;  %s152_s0 = smov [#allocation7]  }
   0xc   :  { %v43_v1 = vperm.slane %v41_v0, 0  ;;  %v44_v2 = vperm.slane %v41_v0, 1  ;;  %v40_v3 = vld [vmem:[#allocation2] sm:$0xf]  ;;  %s56_s19 = sshll.u32 %s152_s0, 4  ;;  %s58_s21 = sshll.u32 %s179_s2, 4  ;;  %s57_s19 = int_to_ptr.vmem [resolvable:$true] %s56_s19  ;;  %s59_s21 = int_to_ptr.hbm [resolvable:$true] %s58_s21 }
   0xe   :  { %v45_v4 = vrot.slane %v44_v2, 6 }
  0x10   :  { %v47_v5 = vsel %vm46_vm0, %v43_v1, %v45_v4 }
  0x11   :  { %v49_v6 = vadd.f32 %v47_v5, %v40_v3 }
  0x13   :  { %50 = vst [vmem:[#allocation7] sm:$0xf] %v49_v6 }
  0x14   :  { %61 = dma.vmem_to_hbm [thread:$0]  %s57_s19, 64, %s59_s21, [#allocation4]  }
  0x15   :  { %148 = dma.done.wait [#allocation4], 64  }
  0x16   :  { %149 = vsyncadd [#allocation4], 4294967232 }
  0x17   :  { %66 = vsyncpa [#allocation3], 1 }
  0x18   :  { %67 = vsyncpa [#allocation6], 1 }
  0x19   :  { %68 = vsyncpa [#allocation4], 1 }

</bundles_post_ra>
